<compile_context>
chip_gen: v5e
topology: v5e:2x2
jax: 0.10.0
libtpu: 0.0.40
codegen_flags: <defaults>
</compile_context>

<pallas_src>
import functools
import math

import jax
import jax.numpy as jnp
from jax.experimental import pallas as pl
from jax.experimental.pallas import tpu as pltpu


def _round_up(x, m):
    return ((x + m - 1) // m) * m


# ---------------------------------------------------------------------------
# Conv1D:  y[..., nf] = x[..., nx] @ W[nx, nf] + b[nf]
# ---------------------------------------------------------------------------
def _conv1d_kernel(x_ref, w_ref, b_ref, o_ref):
    # x_ref: (tm, nx)  w_ref: (nx, tn)  b_ref: (1, tn) f32  o_ref: (tm, tn)
    acc = jnp.dot(x_ref[...], w_ref[...], preferred_element_type=jnp.float32)
    o_ref[...] = (acc + b_ref[...]).astype(o_ref.dtype)


def _pick_nf_tile(nf, target):
    """Largest multiple of 256 (fallback 128) that divides nf and is <= target."""
    for align in (256, 128):
        if nf % align == 0:
            t = (min(target, nf) // align) * align
            while t >= align:
                if nf % t == 0:
                    return t
                t -= align
    # TODO(synk): pad nf (e.g. GPT-2 XL c_attn nf=4800) instead of keeping the
    # full weight block resident when nf has no multiple-of-128 divisor.
    return nf


def conv1d(x, weight, bias, *, tm=512, tn=1024, compute_dtype=None):
    """GPT-2 Conv1D forward: x[..., nx] @ weight[nx, nf] + bias[nf]."""
    *lead, nx = x.shape
    nf = weight.shape[1]

    if compute_dtype is not None and x.dtype != compute_dtype:
        x = x.astype(compute_dtype)
    if compute_dtype is not None and weight.dtype != compute_dtype:
        # Fallback only; prefer prepare_gpt2_attention_params() (one-time cast).
        weight = weight.astype(compute_dtype)

    x2d = x.reshape(-1, nx)
    M = x2d.shape[0]
    itemsize = x2d.dtype.itemsize

    # bf16 packs 16 rows per vreg -> align to 16, else 8.
    align = 16 if x2d.dtype == jnp.bfloat16 else 8
    tm = _round_up(max(align, min(tm, _round_up(M, align))), align)
    Mp = _round_up(M, tm)
    if Mp != M:
        x2d = jnp.pad(x2d, ((0, Mp - M), (0, 0)))

    tn = _pick_nf_tile(nf, tn)

    if bias.ndim != 2 or bias.dtype != jnp.float32:
        b2d = bias.astype(jnp.float32).reshape(1, nf)   # one-time if unprepared
    else:
        b2d = bias

    # VMEM bound: double-buffered x / weight / output tiles plus bias.
    est_vmem = 2 * itemsize * (tm * nx + nx * tn + tm * tn) + 8 * tn
    vmem_limit = int(min(max(32 * 1024 * 1024, 2 * est_vmem), 100 * 1024 * 1024))

    cost = pl.CostEstimate(
        flops=2 * M * nx * nf,
        transcendentals=0,
        bytes_accessed=(Mp * nx + nx * nf + Mp * nf) * itemsize + nf * 4,
    )

    out = pl.pallas_call(
        _conv1d_kernel,
        out_shape=jax.ShapeDtypeStruct((Mp, nf), x2d.dtype),
        grid_spec=pltpu.PrefetchScalarGridSpec(
            num_scalar_prefetch=0,
            grid=(Mp // tm, nf // tn),
            in_specs=[
                pl.BlockSpec((tm, nx), lambda i, j: (i, 0)),   # x row tile
                pl.BlockSpec((nx, tn), lambda i, j: (0, j)),   # weight column tile
                pl.BlockSpec((1, tn), lambda i, j: (0, j)),    # bias column tile
            ],
            out_specs=pl.BlockSpec((tm, tn), lambda i, j: (i, j)),
        ),
        compiler_params=pltpu.CompilerParams(
            dimension_semantics=("parallel", "parallel"),
            vmem_limit_bytes=vmem_limit,
        ),
        cost_estimate=cost,
    )(x2d, weight, b2d)

    if Mp != M:
        out = out[:M]
    return out.reshape(*lead, nf)


# ---------------------------------------------------------------------------
# Causal flash attention on the fused (B, S, 3, H, D) c_attn output.
# ---------------------------------------------------------------------------
def _flash_attn_kernel(q_ref, k_ref, v_ref, o_ref, m_sc, l_sc, acc_sc,
                       *, sm_scale, kv_len, tq, tk, num_heads):
    qi = pl.program_id(1)
    ki = pl.program_id(2)

    @pl.when(ki == 0)
    def _init():
        m_sc[...] = jnp.full(m_sc.shape, -jnp.inf, dtype=m_sc.dtype)
        l_sc[...] = jnp.zeros(l_sc.shape, dtype=l_sc.dtype)
        acc_sc[...] = jnp.zeros(acc_sc.shape, dtype=acc_sc.dtype)

    # Causal block gate: skip key blocks strictly above the diagonal.
    @pl.when(ki * tk <= qi * tq + (tq - 1))
    def _compute():
        q = q_ref[...]          # (tq, H, D)
        k = k_ref[...]          # (tk, H, D)
        v = v_ref[...]          # (tk, H, D)

        row = qi * tq + jax.lax.broadcasted_iota(jnp.int32, (tq, tk), 0)
        col = ki * tk + jax.lax.broadcasted_iota(jnp.int32, (tq, tk), 1)
        mask = (col <= row) & (col < kv_len)
        neg_inf = jnp.finfo(jnp.float32).min

        for h in range(num_heads):      # static unroll: all heads per grid step
            q_h = q[:, h, :]            # (tq, D)
            k_h = k[:, h, :]            # (tk, D)
            v_h = v[:, h, :]            # (tk, D)

            # Q @ K^T with f32 MXU accumulation.
            s = jax.lax.dot_general(
                q_h, k_h, (((1,), (1,)), ((), ())),
                preferred_element_type=jnp.float32)
            s = s * sm_scale
            s = jnp.where(mask, s, neg_inf)

            m_prev = m_sc[h]                                     # (tq, 1)
            m_new = jnp.maximum(m_prev, s.max(axis=-1, keepdims=True))
            alpha = jnp.exp(m_prev - m_new)
            p = jnp.exp(s - m_new)                               # (tq, tk)

            l_sc[h] = alpha * l_sc[h] + p.sum(axis=-1, keepdims=True)
            acc_sc[h] = alpha * acc_sc[h] + jnp.dot(
                p.astype(v_h.dtype), v_h, preferred_element_type=jnp.float32)
            m_sc[h] = m_new

    @pl.when(ki == pl.num_programs(2) - 1)
    def _finalize():
        outs = []
        for h in range(num_heads):
            inv_l = pl.reciprocal(l_sc[h], approx=True)
            outs.append(acc_sc[h] * inv_l)                       # (tq, D) f32
        # Heads merged along lanes -> output already in (S, H*D) layout.
        o_ref[...] = jnp.concatenate(outs, axis=-1).astype(o_ref.dtype)


def causal_flash_attention_fused(qkv, *, num_heads, head_dim, sm_scale,
                                 tq=256, tk=512):
    """qkv: (B, S, 3*H*D) fused c_attn output -> (B, S, H*D) attention output."""
    B, S, three_e = qkv.shape
    H, D = num_heads, head_dim
    E = H * D
    assert three_e == 3 * E
    dtype = qkv.dtype

    align = 16 if dtype == jnp.bfloat16 else 8
    s_cap = _round_up(S, align)
    tq = _round_up(max(align, min(tq, s_cap)), align)
    tk = _round_up(max(align, min(tk, s_cap)), align)
    if tk % tq != 0 and tq % tk != 0:
        tk = tq                      # keep one padded length valid for both tiles
    Sp = _round_up(S, max(tq, tk))

    if Sp != S:
        qkv = jnp.pad(qkv, ((0, 0), (0, Sp - S), (0, 0)))
    # Free reshape: 3E splits as [3][H][D] in memory -- no transpose, no split.
    qkv5 = qkv.reshape(B, Sp, 3, H, D)

    kernel = functools.partial(_flash_attn_kernel, sm_scale=sm_scale,
                               kv_len=S, tq=tq, tk=tk, num_heads=H)

    def q_map(b, qi, ki):
        return (b, qi, 0, 0, 0)

    def kv_map(split):
        def _map(b, qi, ki):
            # Clamp the key-block index: fully-masked (future) K/V blocks repeat
            # the previous index so Pallas never re-DMAs them (the pl.when gate
            # already skips their compute).
            kmax = (qi * tq + (tq - 1)) // tk
            return (b, jnp.minimum(ki, kmax), split, 0, 0)
        return _map

    itemsize = qkv5.dtype.itemsize
    cost = pl.CostEstimate(
        flops=2 * B * H * S * S * D,            # ~causal half of 4*B*H*S*S*D
        transcendentals=B * H * S * S // 2,
        bytes_accessed=(qkv5.size + B * Sp * E) * itemsize,
    )

    out = pl.pallas_call(
        kernel,
        out_shape=jax.ShapeDtypeStruct((B, Sp, E), dtype),
        grid_spec=pltpu.PrefetchScalarGridSpec(
            num_scalar_prefetch=0,
            grid=(B, Sp // tq, Sp // tk),
            in_specs=[
                pl.BlockSpec((None, tq, None, H, D), q_map),      # Q  (split 0)
                pl.BlockSpec((None, tk, None, H, D), kv_map(1)),  # K  (split 1)
                pl.BlockSpec((None, tk, None, H, D), kv_map(2)),  # V  (split 2)
            ],
            out_specs=pl.BlockSpec((None, tq, E), lambda b, qi, ki: (b, qi, 0)),
            scratch_shapes=[
                pltpu.VMEM((H, tq, 1), jnp.float32),   # running max
                pltpu.VMEM((H, tq, 1), jnp.float32),   # running denom
                pltpu.VMEM((H, tq, D), jnp.float32),   # output accumulator
            ],
        ),
        compiler_params=pltpu.CompilerParams(
            dimension_semantics=("parallel", "parallel", "arbitrary"),
            vmem_limit_bytes=32 * 1024 * 1024,
        ),
        cost_estimate=cost,
    )(qkv5, qkv5, qkv5)

    if Sp != S:
        out = out[:, :S, :]
    return out                        # (B, S, E); merge_heads is already done


# ---------------------------------------------------------------------------
# Parameter preparation (one-time casts; no per-call HBM weight cast passes)
# ---------------------------------------------------------------------------
def prepare_gpt2_attention_params(params, *, compute_dtype=jnp.bfloat16):
    wd = compute_dtype if compute_dtype is not None else params["c_attn_w"].dtype
    return {
        "c_attn_w": params["c_attn_w"].astype(wd),
        "c_attn_b": params["c_attn_b"].astype(jnp.float32).reshape(1, -1),
        "c_proj_w": params["c_proj_w"].astype(wd),
        "c_proj_b": params["c_proj_b"].astype(jnp.float32).reshape(1, -1),
    }


# ---------------------------------------------------------------------------
# Full GPT2Attention forward (eval mode, self-attention, no KV cache)
# ---------------------------------------------------------------------------
def gpt2_attention(hidden_states, params, *, num_heads,
                   scale_attn_weights=True,
                   scale_attn_by_inverse_layer_idx=False, layer_idx=None,
                   compute_dtype=jnp.bfloat16, attn_tq=256, attn_tk=512):
    B, S, E = hidden_states.shape
    head_dim = E // num_heads
    in_dtype = hidden_states.dtype

    # c_attn projection -> fused (B, S, 3E)
    qkv = conv1d(hidden_states, params["c_attn_w"], params["c_attn_b"],
                 compute_dtype=compute_dtype)

    sm_scale = 1.0
    if scale_attn_weights:
        sm_scale /= math.sqrt(head_dim)
    if scale_attn_by_inverse_layer_idx:
        sm_scale /= float(layer_idx + 1)

    attn = causal_flash_attention_fused(
        qkv, num_heads=num_heads, head_dim=head_dim, sm_scale=sm_scale,
        tq=attn_tq, tk=attn_tk)                    # (B, S, E), heads pre-merged

    # c_proj projection; resid_dropout is identity at inference.
    out = conv1d(attn, params["c_proj_w"], params["c_proj_b"],
                 compute_dtype=compute_dtype)
    return out.astype(in_dtype)


# ---------------------------------------------------------------------------
# Pure-JAX reference (f32) for correctness checking
# ---------------------------------------------------------------------------
def _reference_gpt2_attention(h, params, *, num_heads, scale_attn_weights=True):
    B, S, E = h.shape
    hd = E // num_heads
    qkv = h.reshape(-1, E) @ params["c_attn_w"] + params["c_attn_b"]
    qkv = qkv.reshape(B, S, 3 * E)
    q, k, v = jnp.split(qkv, 3, axis=-1)

    def sp(t):
        return t.reshape(B, S, num_heads, hd).transpose(0, 2, 1, 3)

    q, k, v = sp(q), sp(k), sp(v)
    w = jnp.einsum("bhqd,bhkd->bhqk", q, k)
    if scale_attn_weights:
        w = w / (hd ** 0.5)
    causal = jnp.tril(jnp.ones((S, S), dtype=bool))
    w = jnp.where(causal, w, jnp.finfo(w.dtype).min)
    w = jax.nn.softmax(w, axis=-1)
    o = jnp.einsum("bhqk,bhkd->bhqd", w, v)
    o = o.transpose(0, 2, 1, 3).reshape(B, S, E)
    o = o.reshape(-1, E) @ params["c_proj_w"] + params["c_proj_b"]
    return o.reshape(B, S, E)


if __name__ == "__main__":
    # Small config consistent with GPT2Attention: embed_dim=32, 4 heads, seq=8.
    batch, seq, hidden, num_heads = 2, 8, 32, 4

    key = jax.random.PRNGKey(0)
    kx, k1, k2 = jax.random.split(key, 3)

    hidden_states = jax.random.normal(kx, (batch, seq, hidden), dtype=jnp.float32)
    # Deterministic params matching nn.init.normal_(std=0.02), zero biases.
    params = {
        "c_attn_w": 0.02 * jax.random.normal(k1, (hidden, 3 * hidden), dtype=jnp.float32),
        "c_attn_b": jnp.zeros((3 * hidden,), dtype=jnp.float32),
        "c_proj_w": 0.02 * jax.random.normal(k2, (hidden, hidden), dtype=jnp.float32),
        "c_proj_b": jnp.zeros((hidden,), dtype=jnp.float32),
    }

    # One-time parameter prep (bf16 weights, f32 (1, nf) biases).
    params_prepped = prepare_gpt2_attention_params(params, compute_dtype=jnp.bfloat16)

    y = gpt2_attention(hidden_states, params_prepped, num_heads=num_heads,
                       compute_dtype=jnp.bfloat16)
    y = jax.block_until_ready(y)

    y_ref = _reference_gpt2_attention(hidden_states, params, num_heads=num_heads)

    assert y.shape == (batch, seq, hidden)
    # bf16 compute with f32 accumulation -> loose tolerance vs f32 reference.
    assert jnp.allclose(y, y_ref, atol=3e-2, rtol=3e-2), (
        f"mismatch vs reference: max abs err {jnp.max(jnp.abs(y - y_ref)):.3e}")

    print("KERNEL_OK")
</pallas_src>

<mosaic_0001>
module attributes {stable_mosaic.version = 11 : i64} {
  func.func @_conv1d_kernel(%arg0: i32, %arg1: i32, %arg2: memref<16x32xbf16, #tpu.memory_space<vmem>>, %arg3: memref<32x96xbf16, #tpu.memory_space<vmem>>, %arg4: memref<1x96xf32, #tpu.memory_space<vmem>>, %arg5: memref<16x96xbf16, #tpu.memory_space<vmem>>) attributes {dimension_semantics = [#tpu.dimension_semantics<parallel>, #tpu.dimension_semantics<parallel>], iteration_bounds = array<i64: 1, 1>, scalar_prefetch = 0 : i64, scratch_operands = 0 : i64, tpu.core_type = #tpu.core_type<tc>, window_params = [{transform_indices = @transform_0, window_bounds = array<i64: 16, 32>}, {transform_indices = @transform_1, window_bounds = array<i64: 32, 96>}, {transform_indices = @transform_2, window_bounds = array<i64: 1, 96>}, {transform_indices = @transform_3, window_bounds = array<i64: 16, 96>}]} {
    %c0 = arith.constant 0 : index
    %c0_0 = arith.constant 0 : index
    %0 = vector.load %arg2[%c0, %c0_0] : memref<16x32xbf16, #tpu.memory_space<vmem>>, vector<16x32xbf16>
    %c0_1 = arith.constant 0 : index
    %c0_2 = arith.constant 0 : index
    %1 = vector.load %arg3[%c0_1, %c0_2] : memref<32x96xbf16, #tpu.memory_space<vmem>>, vector<32x96xbf16>
    %cst = arith.constant dense<0.000000e+00> : vector<16x96xf32>
    %2 = tpu.matmul %0, %1, %cst {dimension_numbers = #tpu.dot_dimension_numbers<[1], [0], [0], [1], [0, 0, 1, 1], [], []>} : vector<16x32xbf16>, vector<32x96xbf16>, vector<16x96xf32> -> vector<16x96xf32>
    %c0_3 = arith.constant 0 : index
    %c0_4 = arith.constant 0 : index
    %3 = vector.load %arg4[%c0_3, %c0_4] : memref<1x96xf32, #tpu.memory_space<vmem>>, vector<1x96xf32>
    %4 = vector.broadcast %3 : vector<1x96xf32> to vector<16x96xf32>
    %5 = arith.addf %2, %4 : vector<16x96xf32>
    %6 = arith.truncf %5 : vector<16x96xf32> to vector<16x96xbf16>
    %c0_5 = arith.constant 0 : index
    %c0_6 = arith.constant 0 : index
    %7 = vector.load %arg5[%c0_5, %c0_6] : memref<16x96xbf16, #tpu.memory_space<vmem>>, vector<16x96xbf16>
    tpu.vector_store %arg5[%c0_5, %c0_6], %6 {strides = array<i32>} : memref<16x96xbf16, #tpu.memory_space<vmem>>, vector<16x96xbf16>,
    return
  }
  func.func @transform_0(%arg0: i32, %arg1: i32) -> (i32, i32) {
    %c0_i32 = arith.constant 0 : i32
    %c0_i32_0 = arith.constant 0 : i32
    return %arg0, %c0_i32 : i32, i32
  }
  func.func @transform_1(%arg0: i32, %arg1: i32) -> (i32, i32) {
    %c0_i32 = arith.constant 0 : i32
    %c0_i32_0 = arith.constant 0 : i32
    return %c0_i32, %arg1 : i32, i32
  }
  func.func @transform_2(%arg0: i32, %arg1: i32) -> (i32, i32) {
    %c0_i32 = arith.constant 0 : i32
    %c0_i32_0 = arith.constant 0 : i32
    return %c0_i32, %arg1 : i32, i32
  }
  func.func @transform_3(%arg0: i32, %arg1: i32) -> (i32, i32) {
    %c0_i32 = arith.constant 0 : i32
    return %arg0, %arg1 : i32, i32
  }
}

</mosaic_0001>

<bundles_post_ra>
// kernel: tpu_custom_call.1
= control target key start
LH: loop header
LB: loop body
LE: loop exit
PB: predicated region body
PF: predicated region fallthrough
CT: control target
= control target key end

     0   :  { %8 = vsyncpa [#allocation3], 0  ;;  %s264_s0 = inlined_call_operand.hbm [shape: bf16[16,32], index: 0, kind: input, shape index: {}]   ;;  %s265_s1 = inlined_call_operand.hbm [shape: bf16[32,96], index: 1, kind: input, shape index: {}]   ;;  %s266_s2 = inlined_call_operand.vmem [shape: f32[1,96], index: 2, kind: input, shape index: {}]   ;;  %s267_s3 = inlined_call_operand.hbm [shape: bf16[16,96], index: 3, kind: output, shape index: {}]  }
   0x1   :  { %9 = vsyncpa [#allocation6], 0 }
   0x2   :  { %10 = vsyncpa [#allocation4], 0  ;;  %s15_s14 = sshll.u32 %s264_s0, 4  ;;  %s218_s15 = smov [#allocation2]   ;;  %s16_s14 = int_to_ptr.hbm [resolvable:$true] %s15_s14 }
   0x3   :  { %s17_s16 = sshll.u32 %s218_s15, 4  ;;  %s28_s19 = sshll.u32 %s265_s1, 4  ;;  %s18_s16 = int_to_ptr.vmem [resolvable:$true] %s17_s16  ;;  %s29_s19 = int_to_ptr.hbm [resolvable:$true] %s28_s19 }
   0x4   :  { %s219_s20 = smov 64   ;;  %s220_s21 = smov 4  }
   0x5   :  { %23 = dma.hbm_to_vmem [thread:$0]  %s16_s14, 128, %s18_s16, [#allocation3], %s219_s20, %s219_s20, %s220_s21  }
   0x6   :  { %s221_s22 = smov [#allocation5]  }
   0x7   :  { %s30_s23 = sshll.u32 %s221_s22, 4  ;;  %s31_s23 = int_to_ptr.vmem [resolvable:$true] %s30_s23 }
   0x8   :  { %36 = dma.hbm_to_vmem [thread:$0]  %s29_s19, 256, %s31_s23, [#allocation6], %s219_s20, %s219_s20, %s220_s21  }
   0x9   :  { %212 = dma.done.wait [#allocation3], 128  }
   0xa   :  { %213 = vsyncadd [#allocation3], 4294967168 }
   0xb   :  { %214 = dma.done.wait [#allocation6], 256  }
   0xc   :  { %215 = vsyncadd [#allocation6], 4294967040  ;;  %v133_v0 = vld [vmem:[#allocation5 + $0x8] sm:$0xff]  ;;  %v132_v1 = vld [vmem:[#allocation5] sm:$0xff]  ;;  %vm75_vm0 = vcmask 261120   ;;  %vm95_vm1 = vcmask 781312  }
   0xd   :  { %85 = vmatpush.bf16.msra.mxu0 %v133_v0  ;;  %v131_v2 = vld [vmem:[#allocation2] sm:$0xff]  ;;  %s222_s24 = smov [#allocation7]   ;;  %s104_s28 = sshll.u32 %s267_s3, 4  ;;  %s105_s28 = int_to_ptr.hbm [resolvable:$true] %s104_s28 }
   0xe   :  { %v139_v3 = vld [vmem:[%s266_s2] ss:$0 sm:$0xff]  ;;  %s102_s25 = sshll.u32 %s222_s24, 4  ;;  %s103_s25 = int_to_ptr.vmem [resolvable:$true] %s102_s25 }
  0x11   :  { %86 = vmatpush.bf16.msra.mxu0 %v132_v1 }
  0x14   :  { %130 = vmatmul.msk.bf16.vlgmr.msra.gmra.mxu0 %vm75_vm0, %v131_v2 }
  0x91   :  { %v88_v4 = vpop.f32.mrf.mxu0 }
  0x92   :  { %v89_v5 = vadd.f32 %v139_v3, %v88_v4 }
  0x94   :  { %v93_v6 = vpack.c.bf16 %v89_v5, %v89_v5 }
  0x96   :  { %96 = vst.msk [vmem:[#allocation7] sm:$0xf] %vm95_vm1, %v93_v6 }
  0x99   :  { %v90_v7 = vpop.f32.mrf.mxu0 }
  0x9a   :  { %v91_v8 = vadd.f32 %v139_v3, %v90_v7 }
  0x9c   :  { %v94_v9 = vpack.c.bf16 %v91_v8, %v91_v8 }
  0x9e   :  { %97 = vst.msk [vmem:[#allocation7 + $0x4] sm:$0xf] %vm95_vm1, %v94_v9 }
  0x9f   :  { %110 = dma.vmem_to_hbm [thread:$0]  %s103_s25, 128, %s105_s28, [#allocation4], %s219_s20, %s219_s20, %s220_s21  }
  0xa0   :  { %216 = dma.done.wait [#allocation4], 128  }
  0xa1   :  { %217 = vsyncadd [#allocation4], 4294967168 }
  0xa2   :  { %115 = vsyncpa [#allocation3], 1 }
  0xa3   :  { %116 = vsyncpa [#allocation6], 1 }
  0xa4   :  { %117 = vsyncpa [#allocation4], 1 }

</bundles_post_ra>
